<compile_context>
chip_gen: v5e
topology: v5e:2x2
jax: 0.10.0
libtpu: 0.0.40
codegen_flags: <defaults>
</compile_context>

<pallas_src>
import jax
import jax.numpy as jnp
from jax.experimental import pallas as pl
from jax.experimental.pallas import tpu as pltpu


def gtconv_kernel(sw_ref, a_ref, o_ref):
    # sw_ref : (C_out, C_in) in SMEM, softmax already applied (row-stochastic)
    # a_ref  : (C_in, TM, TN) VMEM tile of the adjacency stack
    # o_ref  : (C_out, TM, TN) VMEM tile of the output
    c_out, c_in = sw_ref.shape
    # c_in-outer loop: each A channel tile is read from VMEM exactly once;
    # one accumulator per output channel (c_in, c_out are tiny & static).
    a_c = a_ref[0]
    accs = [sw_ref[o, 0] * a_c for o in range(c_out)]
    for c in range(1, c_in):
        a_c = a_ref[c]
        for o in range(c_out):
            accs[o] = accs[o] + sw_ref[o, c] * a_c
    for o in range(c_out):
        o_ref[o] = accs[o].astype(o_ref.dtype)


def _shrink_tile(t, unit):
    """Halve a tile size, keeping it a positive multiple of `unit`."""
    t = t // 2
    return max(unit, (t // unit) * unit)


def gtconv_forward(A, weight, *, tm=256, tn=2048, min_grid_steps=4,
                   vmem_budget_bytes=40 * 1024 * 1024):
    """A: (C_in, N, N) f32; weight: (C_out, C_in, 1, 1) f32 -> (C_out, N, N)."""
    c_in, n, _ = A.shape
    c_out = weight.shape[0]

    # Hoisted softmax over in_channels (done once, not per grid step).
    sw = jax.nn.softmax(weight.reshape(c_out, c_in).astype(jnp.float32), axis=1)

    # --- Tile selection -----------------------------------------------------
    # A block equal to the full extent is always legal; otherwise tiles stay
    # (sublane, lane) = (8, 128)-aligned and Pallas masks edge blocks.
    tm = min(tm, n)
    tn = min(tn, n)

    # VMEM budget guard: double-buffered (C_in + C_out) tiles must fit.
    def db_bytes(tm_, tn_):
        return 2 * (c_in + c_out) * tm_ * tn_ * 4

    while db_bytes(tm, tn) > vmem_budget_bytes and tm > 64:
        tm = _shrink_tile(tm, 8)
    while db_bytes(tm, tn) > vmem_budget_bytes and tn > 128:
        tn = _shrink_tile(tn, 128)

    # Degenerate-grid protection: a single grid step has no software
    # pipelining (DMA-in / compute / DMA-out serialize) and on v7x one of the
    # two TensorCores sits idle.  Shrink rows first (keeps the lane dim dense).
    def n_steps(tm_, tn_):
        return pl.cdiv(n, tm_) * pl.cdiv(n, tn_)

    while n_steps(tm, tn) < min_grid_steps and tm > 8:
        tm = _shrink_tile(tm, 8)
    while n_steps(tm, tn) < min_grid_steps and tn > 128:
        tn = _shrink_tile(tn, 128)

    grid = (pl.cdiv(n, tm), pl.cdiv(n, tn))

    # Pure HBM streaming: (C_in + C_out) * N^2 f32 bytes, trivial VPU flops.
    cost = pl.CostEstimate(
        flops=c_out * (2 * c_in - 1) * n * n,
        transcendentals=0,
        bytes_accessed=(c_in + c_out) * n * n * 4,
    )

    return pl.pallas_call(
        gtconv_kernel,
        out_shape=jax.ShapeDtypeStruct((c_out, n, n), jnp.float32),
        grid_spec=pltpu.PrefetchScalarGridSpec(
            num_scalar_prefetch=0,
            grid=grid,
            in_specs=[
                # Softmaxed weights: tiny table, whole thing in SMEM.
                pl.BlockSpec(memory_space=pltpu.MemorySpace.SMEM),
                # Adjacency stack: keep all C_in channels in the block,
                # tile the spatial plane (lane-major: tn >> tm).
                pl.BlockSpec((c_in, tm, tn), lambda i, j: (0, i, j)),
            ],
            out_specs=pl.BlockSpec((c_out, tm, tn), lambda i, j: (0, i, j)),
        ),
        compiler_params=pltpu.CompilerParams(
            dimension_semantics=("parallel", "parallel"),
            vmem_limit_bytes=48 * 1024 * 1024,
        ),
        cost_estimate=cost,
    )(sw, A)


if __name__ == "__main__":
    in_channels = 4     # number of edge types
    out_channels = 2    # number of output meta-channels
    num_nodes = 256     # small demo; auto-tiling picks (64, 256) tiles -> 4 steps

    # Deterministic parameter init, matching GTConv.reset_parameters:
    # nn.init.constant_(self.weight, 0.1); bias is None; scale unused in forward.
    weight = jnp.full((out_channels, in_channels, 1, 1), 0.1, dtype=jnp.float32)
    scale = jnp.array([0.1], dtype=jnp.float32)  # not used in forward (requires_grad=False)

    key = jax.random.PRNGKey(0)
    A = jax.random.uniform(key, (in_channels, num_nodes, num_nodes),
                           dtype=jnp.float32)

    out = gtconv_forward(A, weight)
    out = jax.block_until_ready(out)

    # Pure-JAX reference.
    w2d = weight.reshape(out_channels, in_channels)
    sw = jax.nn.softmax(w2d, axis=1)
    ref = jnp.sum(sw[:, :, None, None] * A[None, :, :, :], axis=1)
    assert out.shape == (out_channels, num_nodes, num_nodes)
    assert jnp.allclose(out, ref, atol=1e-5, rtol=1e-5)

    # Second check with non-uniform weights (constant-0.1 init makes every
    # softmax weight identical, which would hide per-(o, c) indexing bugs).
    kw, _ = jax.random.split(key)
    weight2 = jax.random.normal(kw, (out_channels, in_channels, 1, 1),
                                dtype=jnp.float32)
    out2 = jax.block_until_ready(gtconv_forward(A, weight2))
    sw2 = jax.nn.softmax(weight2.reshape(out_channels, in_channels), axis=1)
    ref2 = jnp.sum(sw2[:, :, None, None] * A[None, :, :, :], axis=1)
    assert jnp.allclose(out2, ref2, atol=1e-5, rtol=1e-5)

    print("KERNEL_OK")
</pallas_src>

<mosaic_0001>
module attributes {stable_mosaic.version = 11 : i64} {
  func.func @gtconv_kernel(%arg0: i32, %arg1: i32, %arg2: memref<2x4xf32, #tpu.memory_space<smem>>, %arg3: memref<4x64x256xf32, #tpu.memory_space<vmem>>, %arg4: memref<2x64x256xf32, #tpu.memory_space<vmem>>) attributes {dimension_semantics = [#tpu.dimension_semantics<parallel>, #tpu.dimension_semantics<parallel>], iteration_bounds = array<i64: 4, 1>, scalar_prefetch = 0 : i64, scratch_operands = 0 : i64, tpu.core_type = #tpu.core_type<tc>, window_params = [{transform_indices = @transform_0, window_bounds = array<i64: 2, 4>}, {transform_indices = @transform_1, window_bounds = array<i64: 4, 64, 256>}, {transform_indices = @transform_2, window_bounds = array<i64: 2, 64, 256>}]} {
    %c0 = arith.constant 0 : index
    %c0_0 = arith.constant 0 : index
    %c0_1 = arith.constant 0 : index
    %0 = vector.load %arg3[%c0, %c0_0, %c0_1] : memref<4x64x256xf32, #tpu.memory_space<vmem>>, vector<1x64x256xf32>
    %1 = vector.shape_cast %0 : vector<1x64x256xf32> to vector<64x256xf32>
    %c0_2 = arith.constant 0 : index
    %c0_3 = arith.constant 0 : index
    %2 = memref.load %arg2[%c0_2, %c0_3] : memref<2x4xf32, #tpu.memory_space<smem>>
    %3 = vector.broadcast %2 : f32 to vector<64x256xf32>
    %4 = arith.mulf %3, %1 : vector<64x256xf32>
    %c1 = arith.constant 1 : index
    %c0_4 = arith.constant 0 : index
    %5 = memref.load %arg2[%c1, %c0_4] : memref<2x4xf32, #tpu.memory_space<smem>>
    %6 = vector.broadcast %5 : f32 to vector<64x256xf32>
    %7 = arith.mulf %6, %1 : vector<64x256xf32>
    %c1_5 = arith.constant 1 : index
    %c0_6 = arith.constant 0 : index
    %c0_7 = arith.constant 0 : index
    %8 = vector.load %arg3[%c1_5, %c0_6, %c0_7] : memref<4x64x256xf32, #tpu.memory_space<vmem>>, vector<1x64x256xf32>
    %9 = vector.shape_cast %8 : vector<1x64x256xf32> to vector<64x256xf32>
    %c0_8 = arith.constant 0 : index
    %c1_9 = arith.constant 1 : index
    %10 = memref.load %arg2[%c0_8, %c1_9] : memref<2x4xf32, #tpu.memory_space<smem>>
    %11 = vector.broadcast %10 : f32 to vector<64x256xf32>
    %12 = arith.mulf %11, %9 : vector<64x256xf32>
    %13 = arith.addf %4, %12 : vector<64x256xf32>
    %c1_10 = arith.constant 1 : index
    %c1_11 = arith.constant 1 : index
    %14 = memref.load %arg2[%c1_10, %c1_11] : memref<2x4xf32, #tpu.memory_space<smem>>
    %15 = vector.broadcast %14 : f32 to vector<64x256xf32>
    %16 = arith.mulf %15, %9 : vector<64x256xf32>
    %17 = arith.addf %7, %16 : vector<64x256xf32>
    %c2 = arith.constant 2 : index
    %c0_12 = arith.constant 0 : index
    %c0_13 = arith.constant 0 : index
    %18 = vector.load %arg3[%c2, %c0_12, %c0_13] : memref<4x64x256xf32, #tpu.memory_space<vmem>>, vector<1x64x256xf32>
    %19 = vector.shape_cast %18 : vector<1x64x256xf32> to vector<64x256xf32>
    %c0_14 = arith.constant 0 : index
    %c2_15 = arith.constant 2 : index
    %20 = memref.load %arg2[%c0_14, %c2_15] : memref<2x4xf32, #tpu.memory_space<smem>>
    %21 = vector.broadcast %20 : f32 to vector<64x256xf32>
    %22 = arith.mulf %21, %19 : vector<64x256xf32>
    %23 = arith.addf %13, %22 : vector<64x256xf32>
    %c1_16 = arith.constant 1 : index
    %c2_17 = arith.constant 2 : index
    %24 = memref.load %arg2[%c1_16, %c2_17] : memref<2x4xf32, #tpu.memory_space<smem>>
    %25 = vector.broadcast %24 : f32 to vector<64x256xf32>
    %26 = arith.mulf %25, %19 : vector<64x256xf32>
    %27 = arith.addf %17, %26 : vector<64x256xf32>
    %c3 = arith.constant 3 : index
    %c0_18 = arith.constant 0 : index
    %c0_19 = arith.constant 0 : index
    %28 = vector.load %arg3[%c3, %c0_18, %c0_19] : memref<4x64x256xf32, #tpu.memory_space<vmem>>, vector<1x64x256xf32>
    %29 = vector.shape_cast %28 : vector<1x64x256xf32> to vector<64x256xf32>
    %c0_20 = arith.constant 0 : index
    %c3_21 = arith.constant 3 : index
    %30 = memref.load %arg2[%c0_20, %c3_21] : memref<2x4xf32, #tpu.memory_space<smem>>
    %31 = vector.broadcast %30 : f32 to vector<64x256xf32>
    %32 = arith.mulf %31, %29 : vector<64x256xf32>
    %33 = arith.addf %23, %32 : vector<64x256xf32>
    %c1_22 = arith.constant 1 : index
    %c3_23 = arith.constant 3 : index
    %34 = memref.load %arg2[%c1_22, %c3_23] : memref<2x4xf32, #tpu.memory_space<smem>>
    %35 = vector.broadcast %34 : f32 to vector<64x256xf32>
    %36 = arith.mulf %35, %29 : vector<64x256xf32>
    %37 = arith.addf %27, %36 : vector<64x256xf32>
    %c0_24 = arith.constant 0 : index
    %c0_25 = arith.constant 0 : index
    %c0_26 = arith.constant 0 : index
    %38 = vector.load %arg4[%c0_24, %c0_25, %c0_26] : memref<2x64x256xf32, #tpu.memory_space<vmem>>, vector<1x64x256xf32>
    %39 = vector.shape_cast %38 : vector<1x64x256xf32> to vector<64x256xf32>
    %40 = vector.shape_cast %33 : vector<64x256xf32> to vector<1x64x256xf32>
    tpu.vector_store %arg4[%c0_24, %c0_25, %c0_26], %40 {strides = array<i32>} : memref<2x64x256xf32, #tpu.memory_space<vmem>>, vector<1x64x256xf32>,
    %c1_27 = arith.constant 1 : index
    %c0_28 = arith.constant 0 : index
    %c0_29 = arith.constant 0 : index
    %41 = vector.load %arg4[%c1_27, %c0_28, %c0_29] : memref<2x64x256xf32, #tpu.memory_space<vmem>>, vector<1x64x256xf32>
    %42 = vector.shape_cast %41 : vector<1x64x256xf32> to vector<64x256xf32>
    %43 = vector.shape_cast %37 : vector<64x256xf32> to vector<1x64x256xf32>
    tpu.vector_store %arg4[%c1_27, %c0_28, %c0_29], %43 {strides = array<i32>} : memref<2x64x256xf32, #tpu.memory_space<vmem>>, vector<1x64x256xf32>,
    return
  }
  func.func @transform_0(%arg0: i32, %arg1: i32) -> (i32, i32) {
    %c0_i32 = arith.constant 0 : i32
    %c0_i32_0 = arith.constant 0 : i32
    %c0_i32_1 = arith.constant 0 : i32
    return %c0_i32, %c0_i32_0 : i32, i32
  }
  func.func @transform_1(%arg0: i32, %arg1: i32) -> (i32, i32, i32) {
    %c0_i32 = arith.constant 0 : i32
    %c0_i32_0 = arith.constant 0 : i32
    return %c0_i32, %arg0, %arg1 : i32, i32, i32
  }
  func.func @transform_2(%arg0: i32, %arg1: i32) -> (i32, i32, i32) {
    %c0_i32 = arith.constant 0 : i32
    %c0_i32_0 = arith.constant 0 : i32
    return %c0_i32, %arg0, %arg1 : i32, i32, i32
  }
}

</mosaic_0001>

<bundles_post_ra>
// kernel: tpu_custom_call.1
= control target key start
LH: loop header
LB: loop body
LE: loop exit
PB: predicated region body
PF: predicated region fallthrough
CT: control target
= control target key end

     0   :  { %7 = vsyncpa [#allocation5], 0  ;;  %s1676_s0 = inlined_call_operand.hbm [shape: f32[2,4], index: 0, kind: input, shape index: {}]   ;;  %s1677_s1 = inlined_call_operand.hbm [shape: f32[4,256,256], index: 1, kind: input, shape index: {}]   ;;  %s1678_s2 = inlined_call_operand.hbm [shape: f32[2,256,256], index: 2, kind: output, shape index: {}]  }
   0x1   :  { %8 = vsyncpa [#allocation3], 0 }
   0x2   :  { %10 = vsyncpa [#allocation3 + $0x1], 0 }
   0x3   :  { %11 = vsyncpa [#allocation4], 0 }
   0x4   :  { %13 = vsyncpa [#allocation4 + $0x1], 0  ;;  %s1001_s9 = smov 0   ;;  %s1003_s10 = smov 0  }
   0x5   :  { %s1005_s11 = smov 0   ;;  %s1007_s12 = smov 0  }
   0x6   :  { %s1009_s13 = smov 0   ;;  %s1011_s14 = smov 0  }
   0x7 LB: > { %s707_s15 = sadd.s32 4294967295, %s970_s14   ;;  %s708_s16 = sadd.s32 4294967294, %s970_s14   ;;  %s970_s14 = sphi %s1011_s14, %s19_s14   ;;  %s966_s13 = sphi %s1009_s13, %s1761_s13   ;;  %s962_s12 = sphi %s1007_s12, %s1760_s12   ;;  %s958_s11 = sphi %s1005_s11, %s1759_s11   ;;  %s954_s10 = sphi %s1003_s10, %s1758_s10   ;;  %s950_s9 = sphi %s1001_s9, %s1757_s9  }
   0x8   : > { %s31_s17 = sadd.s32 1, %s966_s13  ;;  %s61_s18 = sadd.s32 1, %s958_s11 }
   0x9   : > { %p33_p0 = scmp.ge.s32.totalorder %s31_s17, 4  ;;  %p68_p1 = scmp.ne.s32.totalorder %s958_s11, %s954_s10 }
   0xa   : > { %p69_p2 = scmp.eq.s32.totalorder %s970_s14, 0  ;;  %p74_p3 = scmp.ne.s32.totalorder %s954_s10, %s950_s9 }
   0xb   : > { %s1763_s17 = smov (%p33_p0, %s31_s17), 0  ;;  %p1046_p5 = scmp.eq.s32.totalorder %s707_s15, 0 }
   0xc   : > { %p1042_p4 = por %p69_p2, %p68_p1  ;;  %s56_s21 = ssub.s32 %s966_s13, %s1763_s17 }
   0xd   : > { %p100_p6 = scmp.eq.s32.totalorder %s707_s15, 3  ;;  %p59_p7 = scmp.eq.s32.totalorder %s56_s21, 0 }
   0xe   : > { %p1054_p8 = por %p1046_p5, %p74_p3  ;;  %p106_p10 = scmp.eq.s32.totalorder %s708_s16, 3 }
   0xf   : > { %p1058_p9 = por %p100_p6, %p68_p1  ;;  %p709_p12 = scmp.ge.s32.totalorder %s970_s14, 1 }
  0x10   : > { %s1063_s24 = scalar_select %p59_p7, %s958_s11, %s61_s18  }
  0x11   : > { %p1065_p11 = por %p106_p10, %p74_p3  ;;  %p113_p13 = scmp.lt.s32.totalorder %s970_s14, 5 }
  0x12   : > { %s125_s29 = sshll.u32 %s1676_s0, 4  ;;  %s972_s30 = smov [#allocation2]   ;;  %s126_s29 = int_to_ptr.hbm [resolvable:$true] %s125_s29 }
  0x13   : > { %p1071_p0 = pnand %p709_p12, %p113_p13  ;;  %p711_p3 = scmp.ge.s32.totalorder %s970_s14, 4 }
  0x15   : > { %p824_p1 = pneg %p1071_p0  ;;  %132 = sbr.rel (%p711_p3) target bundleno = 40 (0x28), region = 20 }
  0x17   : > { %p825_p2 = pnand %p824_p1, %p1046_p5 }
  0x19   : > { %827 = dma.hbm_to_smem (!%p825_p2), %s126_s29, 32, %s972_s30, [#allocation5]  }
  0x1a   : > { %s136_s3 = sand.u32 1, %s958_s11   ;;  %s800_s4 = sshll.u32 %s966_s13, 7 }
  0x1b   : > { %s712_s5 = sshll.u32 %s136_s3, 9  ;;  %s148_s8 = scalar_lea.hbm %s1677_s1, %s800_s4 }
  0x1c   : > { %s805_s15 = scalar_select %p1042_p4, [#allocation0], [#allocation12] }
  0x1d   : > { %s161_s16 = sshll.u32 %s148_s8, 4  ;;  %s140_s18 = scalar_lea.vmem [#allocation6], %s712_s5  ;;  %s162_s16 = int_to_ptr.hbm [resolvable:$true] %s161_s16 }
  0x1e   : > { %s163_s21 = sshll.u32 %s140_s18, 4  ;;  %s153_s27 = sld [smem:[%s805_s15]]   ;;  %s164_s21 = int_to_ptr.vmem [resolvable:$true] %s163_s21 }
  0x1f   : > { %s973_s28 = smov 8192   ;;  %s974_s29 = smov 2048  }
  0x20   : > { %806 = sst [smem:[#allocation9]] (%p1042_p4), %s973_s28  ;;  %s975_s30 = smov 8  }
  0x21   : > { %807 = sst [smem:[#allocation9 + $0x1]] (%p1042_p4), %s974_s29  ;;  %s976_s4 = smov 256  }
  0x22   : > { %808 = sst [smem:[#allocation9 + $0x2]] (%p1042_p4), %s975_s30  ;;  %s977_s7 = smov 16  }
  0x23   : > { %809 = sst [smem:[#allocation9 + $0x3]] (%p1042_p4), %s976_s4  ;;  %s137_s8 = scalar_lea.sflag [#allocation3], %s136_s3 }
  0x24   : > { %s716_s6 = sshll.u32 %s153_s27, 26  ;;  %810 = sst [smem:[#allocation9 + $0x4]] (%p1042_p4), %s976_s4 }
  0x25   : > { %s717_s5 = sadd.s32 134217728, %s716_s6  ;;  %811 = sst [smem:[#allocation9 + $0x5]] (%p1042_p4), %s977_s7 }
  0x26   : > { %s978_s15 = smov [#allocation8]  }
  0x27   : > { %812 = dma.general (%p1042_p4), %s162_s16, 8192, %s164_s21, %s137_s8, %s978_s15, [#allocation9], %s717_s5, 0  }
  0x28 PF: > { %188 = sbr.rel (%p1071_p0) target bundleno = 146 (0x92), region = 28 }
  0x2d   : > { %937 = dma.done.wait (%p1046_p5), [#allocation5], 32  }
  0x2e   : > { %939 = vsyncadd (%p1046_p5), [#allocation5], 4294967264  ;;  %s1111_s18 = sand.u32 1, %s954_s10  }
  0x2f   : > { %s720_s3 = sshll.u32 %s1111_s18, 9  ;;  %s196_s27 = scalar_lea.sflag [#allocation3], %s1111_s18 }
  0x30   : > { %s1115_s19 = scalar_lea.vmem [#allocation6], %s720_s3 }
  0x31   : > { %941 = dma.done.wait (%p1054_p8), %s196_s27, 8192  }
  0x32   : > { %943 = vsyncadd (%p1054_p8), %s196_s27, 4294959104 }
  0x33   : > { %205 = sfence }
  0x34   : > { %s242_s26 = sld [smem:[#allocation2]]  ;;  %v1122_v0 = vld [vmem:[%s1115_s19] sm:$0xff]  ;;  %v1125_v1 = vld [vmem:[%s1115_s19 + $0x8] sm:$0xff]  ;;  %v1128_v2 = vld [vmem:[%s1115_s19 + $0x10] sm:$0xff]  ;;  %s721_s22 = sshll.u32 %s1111_s18, 8 }
  0x35   : > { %s739_s20 = sld [smem:[#allocation2 + $0x1]]  ;;  %v1131_v3 = vld [vmem:[%s1115_s19 + $0x80] sm:$0xff]  ;;  %v1134_v4 = vld [vmem:[%s1115_s19 + $0x88] sm:$0xff]  ;;  %v1137_v5 = vld [vmem:[%s1115_s19 + $0x90] sm:$0xff]  ;;  %s1264_s28 = scalar_lea.vmem [#allocation7], %s721_s22 }
  0x36   : > { %s757_s16 = sld [smem:[#allocation2 + $0x2]]  ;;  %v1142_v7 = vld [vmem:[%s1115_s19 + $0x100] sm:$0xff]  ;;  %v1145_v8 = vld [vmem:[%s1115_s19 + $0x108] sm:$0xff]  ;;  %v1148_v9 = vld [vmem:[%s1115_s19 + $0x110] sm:$0xff]  ;;  %s567_s5 = scalar_lea.sflag [#allocation4], %s1111_s18 }
  0x37   : > { %s775_s21 = sld [smem:[#allocation2 + $0x3]]  ;;  %v1155_v12 = vld [vmem:[%s1115_s19 + $0x180] sm:$0xff]  ;;  %v1160_v14 = vld [vmem:[%s1115_s19 + $0x188] sm:$0xff]  ;;  %v1173_v20 = vld [vmem:[%s1115_s19 + $0x190] sm:$0xff] }
  0x38   : > { %v1176_v21 = vld [vmem:[%s1115_s19 + $0x18] sm:$0xff]  ;;  %v1201_v33 = vld [vmem:[%s1115_s19 + $0x20] sm:$0xff]  ;;  %v1223_v45 = vld [vmem:[%s1115_s19 + $0x28] sm:$0xff]  ;;  %s1389_s29 = sld [smem:[#allocation2 + $0x80]] }
  0x39   : > { %v1179_v22 = vld [vmem:[%s1115_s19 + $0x98] sm:$0xff]  ;;  %v1204_v34 = vld [vmem:[%s1115_s19 + $0xa0] sm:$0xff]  ;;  %v1226_v46 = vld [vmem:[%s1115_s19 + $0xa8] sm:$0xff]  ;;  %s1400_s30 = sld [smem:[#allocation2 + $0x81]] }
  0x3a   : > { %v1139_v6 = vstv %s242_s26  ;;  %v1190_v27 = vld [vmem:[%s1115_s19 + $0x118] sm:$0xff]  ;;  %v1213_v39 = vld [vmem:[%s1115_s19 + $0x120] sm:$0xff]  ;;  %v1233_v51 = vld [vmem:[%s1115_s19 + $0x128] sm:$0xff]  ;;  %s1417_s4 = sld [smem:[#allocation2 + $0x82]] }
  0x3b   : > { %v244_v10 = vmul.f32 %v1139_v6, %v1122_v0  ;;  %v1152_v11 = vstv %s739_s20  ;;  %v245_v13 = vmul.f32 %v1139_v6, %v1125_v1  ;;  %v246_v15 = vmul.f32 %v1139_v6, %v1128_v2  ;;  %v1193_v28 = vld [vmem:[%s1115_s19 + $0x198] sm:$0xff]  ;;  %v1216_v40 = vld [vmem:[%s1115_s19 + $0x1a0] sm:$0xff]  ;;  %v1236_v52 = vld [vmem:[%s1115_s19 + $0x1a8] sm:$0xff]  ;;  %s1430_s6 = sld [smem:[#allocation2 + $0x83]] }
  0x3c   : > { %v297_v16 = vmul.f32 %v1131_v3, %v1152_v11  ;;  %v1166_v17 = vstv %s757_s16  ;;  %v298_v18 = vmul.f32 %v1134_v4, %v1152_v11  ;;  %v299_v19 = vmul.f32 %v1137_v5, %v1152_v11  ;;  %v1239_v53 = vld [vmem:[%s1115_s19 + $0x30] sm:$0xff] }
  0x3d   : > { %v382_v23 = vmul.f32 %v1142_v7, %v1166_v17  ;;  %v1183_v24 = vstv %s775_s21  ;;  %v383_v25 = vmul.f32 %v1145_v8, %v1166_v17  ;;  %v384_v26 = vmul.f32 %v1148_v9, %v1166_v17  ;;  %v1246_v58 = vld [vmem:[%s1115_s19 + $0xb0] sm:$0xff] }
  0x3e   : > { %v313_v29 = vadd.f32 %v297_v16, %v244_v10  ;;  %v467_v30 = vmul.f32 %v1155_v12, %v1183_v24  ;;  %v314_v31 = vadd.f32 %v298_v18, %v245_v13  ;;  %v468_v32 = vmul.f32 %v1160_v14, %v1183_v24  ;;  %v1249_v59 = vld [vmem:[%s1115_s19 + $0x130] sm:$0xff]  ;;  %v1257_v13 = vld [vmem:[%s1115_s19 + $0x38] sm:$0xff] }
  0x3f   : > { %v315_v35 = vadd.f32 %v299_v19, %v246_v15  ;;  %v469_v36 = vmul.f32 %v1173_v20, %v1183_v24  ;;  %v247_v37 = vmul.f32 %v1139_v6, %v1176_v21  ;;  %v300_v38 = vmul.f32 %v1179_v22, %v1152_v11  ;;  %v1254_v10 = vld [vmem:[%s1115_s19 + $0x1b0] sm:$0xff]  ;;  %v1260_v15 = vld [vmem:[%s1115_s19 + $0xb8] sm:$0xff] }
  0x40   : > { %v398_v41 = vadd.f32 %v382_v23, %v313_v29  ;;  %v399_v42 = vadd.f32 %v383_v25, %v314_v31  ;;  %v385_v43 = vmul.f32 %v1190_v27, %v1166_v17  ;;  %v470_v44 = vmul.f32 %v1193_v28, %v1183_v24  ;;  %v1276_v25 = vld [vmem:[%s1115_s19 + $0x138] sm:$0xff] }
  0x41   : > { %v400_v47 = vadd.f32 %v384_v26, %v315_v35  ;;  %v316_v48 = vadd.f32 %v300_v38, %v247_v37  ;;  %v248_v49 = vmul.f32 %v1139_v6, %v1201_v33  ;;  %v301_v50 = vmul.f32 %v1204_v34, %v1152_v11  ;;  %v1279_v26 = vld [vmem:[%s1115_s19 + $0x1b8] sm:$0xff]  ;;  %v1287_v35 = vld [vmem:[%s1115_s19 + $0x40] sm:$0xff] }
  0x42   : > { %v483_v54 = vadd.f32 %v467_v30, %v398_v41  ;;  %v484_v55 = vadd.f32 %v468_v32, %v399_v42  ;;  %v386_v56 = vmul.f32 %v1213_v39, %v1166_v17  ;;  %v471_v57 = vmul.f32 %v1216_v40, %v1183_v24 }
  0x43   : > { %v485_v60 = vadd.f32 %v469_v36, %v400_v47  ;;  %v401_v61 = vadd.f32 %v385_v43, %v316_v48  ;;  %v317_v62 = vadd.f32 %v301_v50, %v248_v49  ;;  %v249_v63 = vmul.f32 %v1139_v6, %v1223_v45  ;;  %v1290_v36 = vld [vmem:[%s1115_s19 + $0xc0] sm:$0xff]  ;;  %v1306_v47 = vld [vmem:[%s1115_s19 + $0x48] sm:$0xff] }
  0x44   : > { %533 = vst [vmem:[%s1264_s28] sm:$0xff] %v483_v54  ;;  %v302_v16 = vmul.f32 %v1226_v46, %v1152_v11  ;;  %v387_v18 = vmul.f32 %v1233_v51, %v1166_v17  ;;  %v472_v19 = vmul.f32 %v1236_v52, %v1183_v24  ;;  %v250_v23 = vmul.f32 %v1139_v6, %v1239_v53  ;;  %v1300_v43 = vld [vmem:[%s1115_s19 + $0x140] sm:$0xff] }
  0x45   : > { %534 = vst [vmem:[%s1264_s28 + $0x8] sm:$0xff] %v484_v55  ;;  %v486_v29 = vadd.f32 %v470_v44, %v401_v61  ;;  %v402_v30 = vadd.f32 %v386_v56, %v317_v62  ;;  %v303_v31 = vmul.f32 %v1246_v58, %v1152_v11  ;;  %v388_v32 = vmul.f32 %v1249_v59, %v1166_v17  ;;  %v1303_v44 = vld [vmem:[%s1115_s19 + $0x1c0] sm:$0xff]  ;;  %v1314_v55 = vld [vmem:[%s1115_s19 + $0xc8] sm:$0xff] }
  0x46   : > { %1709 = vst [vmem:[#allocation16_spill] sm:$0xff] %v1290_v36  ;;  %v318_v37 = vadd.f32 %v302_v16, %v249_v63  ;;  %v473_v38 = vmul.f32 %v1254_v10, %v1183_v24  ;;  %v251_v41 = vmul.f32 %v1139_v6, %v1257_v13  ;;  %v304_v42 = vmul.f32 %v1260_v15, %v1152_v11  ;;  %v1321_v62 = vld [vmem:[%s1115_s19 + $0x148] sm:$0xff]  ;;  %v1327_v16 = vld [vmem:[%s1115_s19 + $0x50] sm:$0xff] }
  0x47   : > { %535 = vst [vmem:[%s1264_s28 + $0x10] sm:$0xff] %v485_v60  ;;  %v487_v48 = vadd.f32 %v471_v57, %v402_v30  ;;  %v319_v49 = vadd.f32 %v303_v31, %v250_v23  ;;  %v389_v50 = vmul.f32 %v1276_v25, %v1166_v17  ;;  %v474_v54 = vmul.f32 %v1279_v26, %v1183_v24  ;;  %v1324_v63 = vld [vmem:[%s1115_s19 + $0x1c8] sm:$0xff]  ;;  %v1337_v31 = vld [vmem:[%s1115_s19 + $0xd0] sm:$0xff] }
  0x48   : > { %1710 = vst [vmem:[#allocation17_spill] sm:$0xff] %v1300_v43  ;;  %v403_v56 = vadd.f32 %v387_v18, %v318_v37  ;;  %v320_v60 = vadd.f32 %v304_v42, %v251_v41  ;;  %v252_v61 = vmul.f32 %v1139_v6, %v1287_v35  ;;  %v305_v57 = vmul.f32 %v1290_v36, %v1152_v11  ;;  %v1340_v37 = vld [vmem:[%s1115_s19 + $0x150] sm:$0xff] }
  0x49   : > { %1711 = vst [vmem:[#allocation18_spill] sm:$0xff] %v1303_v44  ;;  %v404_v23 = vadd.f32 %v388_v32, %v319_v49  ;;  %v390_v18 = vmul.f32 %v1300_v43, %v1166_v17  ;;  %v253_v30 = vmul.f32 %v1139_v6, %v1306_v47  ;;  %v306_v32 = vmul.f32 %v1314_v55, %v1152_v11  ;;  %v1345_v49 = vld [vmem:[%s1115_s19 + $0x1d0] sm:$0xff]  ;;  %v1351_v43 = vld [vmem:[%s1115_s19 + $0xd8] sm:$0xff] }
  0x4a   : > { %1712 = vst [vmem:[#allocation19_spill] sm:$0xff] %v1306_v47  ;;  %v488_v41 = vadd.f32 %v472_v19, %v403_v56  ;;  %v405_v42 = vadd.f32 %v389_v50, %v320_v60  ;;  %v391_v36 = vmul.f32 %v1321_v62, %v1166_v17  ;;  %v476_v19 = vmul.f32 %v1324_v63, %v1183_v24  ;;  %v1360_v56 = vld [vmem:[%s1115_s19 + $0x158] sm:$0xff] }
  0x4b   : > { %536 = vst [vmem:[%s1264_s28 + $0x18] sm:$0xff] %v486_v29  ;;  %v475_v29 = vmul.f32 %v1303_v44, %v1183_v24  ;;  %v1348_v44 = vld [vmem:[%s1115_s19 + $0x58] sm:$0xff]  ;;  %v489_v47 = vadd.f32 %v473_v38, %v404_v23  ;;  %v254_v50 = vmul.f32 %v1139_v6, %v1327_v16  ;;  %v307_v38 = vmul.f32 %v1337_v31, %v1152_v11 }
  0x4c   : > { %1713 = vst [vmem:[#allocation20_spill] sm:$0xff] %v1321_v62  ;;  %v490_v60 = vadd.f32 %v474_v54, %v405_v42  ;;  %v1366_v23 = vld [vmem:[%s1115_s19 + $0x1d8] sm:$0xff]  ;;  %v1369_v62 = vld [vmem:[%s1115_s19 + $0x60] sm:$0xff]  ;;  %v477_v54 = vmul.f32 %v1345_v49, %v1183_v24 }
  0x4d   : > { %1714 = vst [vmem:[#allocation21_spill] sm:$0xff] %v1324_v63  ;;  %v1372_v63 = vld [vmem:[%s1115_s19 + $0xe0] sm:$0xff] }
  0x4e   : > { %1715 = vst [vmem:[#allocation22_spill] sm:$0xff] %v1327_v16  ;;  %v392_v16 = vmul.f32 %v1340_v37, %v1166_v17  ;;  %v1387_v42 = vld [vmem:[%s1115_s19 + $0x1e0] sm:$0xff] }
  0x4f   : > { %537 = vst [vmem:[%s1264_s28 + $0x20] sm:$0xff] %v487_v48  ;;  %v321_v48 = vadd.f32 %v305_v57, %v252_v61  ;;  %v322_v57 = vadd.f32 %v306_v32, %v253_v30  ;;  %v308_v30 = vmul.f32 %v1351_v43, %v1152_v11  ;;  %v323_v32 = vadd.f32 %v307_v38, %v254_v50  ;;  %v1409_v50 = vld [vmem:[%s1115_s19 + $0x168] sm:$0xff] }
  0x50   : > { %1716 = vst [vmem:[#allocation23_spill] sm:$0xff] %v1337_v31  ;;  %v478_v31 = vmul.f32 %v1366_v23, %v1183_v24 }
  0x51   : > { %1717 = vst [vmem:[#allocation24_spill] sm:$0xff] %v1340_v37  ;;  %v406_v61 = vadd.f32 %v390_v18, %v321_v48  ;;  %v255_v18 = vmul.f32 %v1139_v6, %v1348_v44  ;;  %v407_v48 = vadd.f32 %v391_v36, %v322_v57  ;;  %v309_v36 = vmul.f32 %v1372_v63, %v1152_v11 }
  0x52   : > { %1718 = vst [vmem:[#allocation25_spill] sm:$0xff] %v1345_v49  ;;  %v1395_v49 = vld [vmem:[%s1115_s19 + $0x68] sm:$0xff]  ;;  %v408_v38 = vadd.f32 %v392_v16, %v323_v32  ;;  %v1443_v32 = vld [vmem:[%s1115_s19 + $0xf8] sm:$0xff] }
  0x53   : > { %1719 = vst [vmem:[#allocation26_spill] sm:$0xff] %v1348_v44  ;;  %v393_v44 = vmul.f32 %v1360_v56, %v1166_v17  ;;  %v324_v37 = vadd.f32 %v308_v30, %v255_v18  ;;  %v492_v57 = vadd.f32 %v476_v19, %v407_v48  ;;  %v479_v30 = vmul.f32 %v1387_v42, %v1183_v24  ;;  %v1440_v48 = vld [vmem:[%s1115_s19 + $0x78] sm:$0xff] }
  0x54   : > { %1720 = vst [vmem:[#allocation27_spill] sm:$0xff] %v1351_v43  ;;  %v1398_v43 = vld [vmem:[%s1115_s19 + $0xe8] sm:$0xff]  ;;  %v257_v19 = vmul.f32 %v1139_v6, %v1395_v49 }
  0x55   : > { %1721 = vst [vmem:[#allocation28_spill] sm:$0xff] %v1360_v56  ;;  %v310_v16 = vmul.f32 %v1398_v43, %v1152_v11 }
  0x56   : > { %538 = vst [vmem:[%s1264_s28 + $0x28] sm:$0xff] %v488_v41  ;;  %v1384_v41 = vld [vmem:[%s1115_s19 + $0x160] sm:$0xff] }
  0x57   : > { %1722 = vst [vmem:[#allocation29_spill] sm:$0xff] %v1366_v23  ;;  %v394_v18 = vmul.f32 %v1384_v41, %v1166_v17  ;;  %v409_v23 = vadd.f32 %v393_v44, %v324_v37  ;;  %v395_v44 = vmul.f32 %v1409_v50, %v1166_v17 }
  0x58   : > { %1723 = vst [vmem:[#allocation30_spill] sm:$0xff] %v1369_v62 }
  0x59   : > { %1724 = vst [vmem:[#allocation31_spill] sm:$0xff] %v1372_v63  ;;  %v1425_v63 = vld [vmem:[%s1115_s19 + $0xf0] sm:$0xff] }
  0x5a   : > { %539 = vst [vmem:[%s1264_s28 + $0x30] sm:$0xff] %v489_v47  ;;  %v491_v47 = vadd.f32 %v475_v29, %v406_v61  ;;  %v256_v29 = vmul.f32 %v1139_v6, %v1369_v62  ;;  %v1415_v61 = vld [vmem:[%s1115_s19 + $0x70] sm:$0xff] }
  0x5b   : > { %1725 = vst [vmem:[#allocation32_spill] sm:$0xff] %v1384_v41  ;;  %v1428_v62 = vld [vmem:[%s1115_s19 + $0x170] sm:$0xff]  ;;  %v326_v41 = vadd.f32 %v310_v16, %v257_v19 }
  0x5c   : > { %1726 = vst [vmem:[#allocation33_spill] sm:$0xff] %v1387_v42  ;;  %v325_v56 = vadd.f32 %v309_v36, %v256_v29  ;;  %v493_v42 = vadd.f32 %v477_v54, %v408_v38  ;;  %v258_v29 = vmul.f32 %v1139_v6, %v1415_v61  ;;  %v1453_v36 = vld [vmem:[%s1115_s19 + $0x178] sm:$0xff]  ;;  %v396_v38 = vmul.f32 %v1428_v62, %v1166_v17 }
  0x5d   : > { %540 = vst [vmem:[%s1264_s28 + $0x38] sm:$0xff] %v490_v60  ;;  %v1412_v60 = vld [vmem:[%s1115_s19 + $0x1e8] sm:$0xff]  ;;  %v1458_v54 = vld [vmem:[%s1115_s19 + $0x1f8] sm:$0xff] }
  0x5e   : > { %1727 = vst [vmem:[#allocation34_spill] sm:$0xff] %v1395_v49  ;;  %v480_v37 = vmul.f32 %v1412_v60, %v1183_v24  ;;  %v410_v49 = vadd.f32 %v394_v18, %v325_v56  ;;  %v312_v56 = vmul.f32 %v1443_v32, %v1152_v11  ;;  %v411_v18 = vadd.f32 %v395_v44, %v326_v41 }
  0x5f   : > { %1728 = vst [vmem:[#allocation35_spill] sm:$0xff] %v1398_v43  ;;  %v494_v43 = vadd.f32 %v478_v31, %v409_v23  ;;  %v259_v31 = vmul.f32 %v1139_v6, %v1440_v48  ;;  %v1478_v6 = vstv %s1400_s30 }
  0x60   : > { %1729 = vst [vmem:[#allocation36_spill] sm:$0xff] %v1415_v61  ;;  %v495_v23 = vadd.f32 %v479_v30, %v410_v49  ;;  %v331_v49 = vmul.f32 %v1131_v3, %v1478_v6  ;;  %v1489_v30 = vstv %s1430_s6  ;;  %v332_v3 = vmul.f32 %v1134_v4, %v1478_v6 }
  0x61   : > { %541 = vst [vmem:[%s1264_s28 + $0x40] sm:$0xff] %v491_v47  ;;  %v1437_v47 = vld [vmem:[%s1115_s19 + $0x1f0] sm:$0xff]  ;;  %v328_v16 = vadd.f32 %v312_v56, %v259_v31  ;;  %v502_v31 = vmul.f32 %v1160_v14, %v1489_v30 }
  0x62   : > { %1730 = vst [vmem:[#allocation37_spill] sm:$0xff] %v1428_v62  ;;  %v481_v61 = vmul.f32 %v1437_v47, %v1183_v24  ;;  %v1475_v62 = vstv %s1389_s29 }
  0x63   : > { %1731 = vst [vmem:[#allocation38_spill] sm:$0xff] %v1437_v47  ;;  %v482_v47 = vmul.f32 %v1458_v54, %v1183_v24  ;;  %v263_v24 = vmul.f32 %v1475_v62, %v1125_v1  ;;  %v265_v14 = vmul.f32 %v1475_v62, %v1176_v21  ;;  %v335_v21 = vmul.f32 %v1204_v34, %v1478_v6 }
  0x64   : > { %1732 = vst [vmem:[#allocation39_spill] sm:$0xff] %v1443_v32 }
  0x65   : > { %542 = vst [vmem:[%s1264_s28 + $0x48] sm:$0xff] %v492_v57  ;;  %v311_v57 = vmul.f32 %v1425_v63, %v1152_v11  ;;  %v496_v11 = vadd.f32 %v480_v37, %v411_v18  ;;  %v348_v4 = vadd.f32 %v332_v3, %v263_v24  ;;  %v1734_v3 = vld [vmem:[#allocation17_spill] sm:$0xff] }
  0x66   : > { %543 = vst [vmem:[%s1264_s28 + $0x50] sm:$0xff] %v493_v42  ;;  %v397_v42 = vmul.f32 %v1453_v36, %v1166_v17  ;;  %v1486_v17 = vstv %s1417_s4 }
  0x67   : > { %544 = vst [vmem:[%s1264_s28 + $0x58] sm:$0xff] %v494_v43  ;;  %v327_v19 = vadd.f32 %v311_v57, %v258_v29  ;;  %v262_v43 = vmul.f32 %v1475_v62, %v1122_v0  ;;  %v416_v29 = vmul.f32 %v1142_v7, %v1486_v17  ;;  %v501_v0 = vmul.f32 %v1155_v12, %v1489_v30 }
  0x68   : > { %545 = vst [vmem:[%s1264_s28 + $0x60] sm:$0xff] %v495_v23  ;;  %v413_v41 = vadd.f32 %v397_v42, %v328_v16  ;;  %v333_v7 = vmul.f32 %v1137_v5, %v1478_v6  ;;  %v418_v12 = vmul.f32 %v1148_v9, %v1486_v17  ;;  %v419_v56 = vmul.f32 %v1190_v27, %v1486_v17 }
  0x69   : > { %v412_v32 = vadd.f32 %v396_v38, %v327_v19  ;;  %546 = vst [vmem:[%s1264_s28 + $0x68] sm:$0xff] %v496_v11  ;;  %v347_v37 = vadd.f32 %v331_v49, %v262_v43  ;;  %v417_v38 = vmul.f32 %v1145_v8, %v1486_v17  ;;  %v503_v8 = vmul.f32 %v1173_v20, %v1489_v30 }
  0x6a   : > { %v498_v57 = vadd.f32 %v482_v47, %v413_v41  ;;  %v334_v47 = vmul.f32 %v1179_v22, %v1478_v6  ;;  %v504_v5 = vmul.f32 %v1193_v28, %v1489_v30  ;;  %v266_v20 = vmul.f32 %v1475_v62, %v1201_v33 }
  0x6b   : > { %v497_v44 = vadd.f32 %v481_v61, %v412_v32  ;;  %v432_v1 = vadd.f32 %v416_v29, %v347_v37  ;;  %v264_v61 = vmul.f32 %v1475_v62, %v1128_v2  ;;  %v433_v9 = vadd.f32 %v417_v38, %v348_v4  ;;  %v1737_v4 = vld [vmem:[#allocation20_spill] sm:$0xff] }
  0x6c   : > { %548 = vst [vmem:[%s1264_s28 + $0x78] sm:$0xff] %v498_v57  ;;  %v350_v23 = vadd.f32 %v334_v47, %v265_v14  ;;  %v420_v22 = vmul.f32 %v1213_v39, %v1486_v17  ;;  %v505_v27 = vmul.f32 %v1216_v40, %v1489_v30  ;;  %v267_v28 = vmul.f32 %v1475_v62, %v1223_v45  ;;  %v1738_v14 = vld [vmem:[#allocation21_spill] sm:$0xff] }
  0x6d   : > { %547 = vst [vmem:[%s1264_s28 + $0x70] sm:$0xff] %v497_v44  ;;  %v517_v32 = vadd.f32 %v501_v0, %v432_v1  ;;  %v349_v2 = vadd.f32 %v333_v7, %v264_v61  ;;  %v518_v19 = vadd.f32 %v502_v31, %v433_v9  ;;  %v351_v16 = vadd.f32 %v335_v21, %v266_v20  ;;  %v1735_v31 = vld [vmem:[#allocation18_spill] sm:$0xff]  ;;  %v1736_v7 = vld [vmem:[#allocation19_spill] sm:$0xff] }
  0x6e   : > { %v435_v42 = vadd.f32 %v419_v56, %v350_v23  ;;  %v336_v33 = vmul.f32 %v1226_v46, %v1478_v6  ;;  %v421_v11 = vmul.f32 %v1233_v51, %v1486_v17  ;;  %v506_v39 = vmul.f32 %v1236_v52, %v1489_v30  ;;  %v1740_v23 = vld [vmem:[#allocation23_spill] sm:$0xff] }
  0x6f   : > { %777 = vst [vmem:[%s1264_s28 + $0x80] sm:$0xff] %v517_v32  ;;  %v434_v18 = vadd.f32 %v418_v12, %v349_v2  ;;  %v268_v40 = vmul.f32 %v1475_v62, %v1239_v53  ;;  %v436_v45 = vadd.f32 %v420_v22, %v351_v16  ;;  %v337_v41 = vmul.f32 %v1246_v58, %v1478_v6  ;;  %v1739_v32 = vld [vmem:[#allocation22_spill] sm:$0xff] }
  0x70   : > { %778 = vst [vmem:[%s1264_s28 + $0x88] sm:$0xff] %v518_v19  ;;  %v520_v43 = vadd.f32 %v504_v5, %v435_v42  ;;  %v352_v49 = vadd.f32 %v336_v33, %v267_v28  ;;  %v422_v46 = vmul.f32 %v1249_v59, %v1486_v17  ;;  %v507_v51 = vmul.f32 %v1254_v10, %v1489_v30  ;;  %v1744_v19 = vld [vmem:[#allocation27_spill] sm:$0xff] }
  0x71   : > { %v519_v34 = vadd.f32 %v503_v8, %v434_v18  ;;  %v269_v52 = vmul.f32 %v1475_v62, %v1257_v13  ;;  %v338_v53 = vmul.f32 %v1260_v15, %v1478_v6  ;;  %v521_v24 = vadd.f32 %v505_v27, %v436_v45  ;;  %v1733_v13 = vld [vmem:[#allocation16_spill] sm:$0xff]  ;;  %v1742_v18 = vld [vmem:[#allocation25_spill] sm:$0xff]  ;;  %v1743_v27 = vld [vmem:[#allocation26_spill] sm:$0xff] }
  0x72   : > { %780 = vst [vmem:[%s1264_s28 + $0x98] sm:$0xff] %v520_v43  ;;  %v437_v44 = vadd.f32 %v421_v11, %v352_v49  ;;  %v353_v37 = vadd.f32 %v337_v41, %v268_v40  ;;  %v423_v58 = vmul.f32 %v1276_v25, %v1486_v17  ;;  %v508_v59 = vmul.f32 %v1279_v26, %v1489_v30  ;;  %v1745_v11 = vld [vmem:[#allocation28_spill] sm:$0xff]  ;;  %v1746_v43 = vld [vmem:[#allocation29_spill] sm:$0xff]  ;;  %v1747_v49 = vld [vmem:[#allocation30_spill] sm:$0xff] }
  0x73   : > { %779 = vst [vmem:[%s1264_s28 + $0x90] sm:$0xff] %v519_v34  ;;  %v354_v29 = vadd.f32 %v338_v53, %v269_v52  ;;  %v270_v10 = vmul.f32 %v1475_v62, %v1287_v35  ;;  %v339_v0 = vmul.f32 %v1733_v13, %v1478_v6  ;;  %v424_v38 = vmul.f32 %v1734_v3, %v1486_v17 }
  0x74   : > { %781 = vst [vmem:[%s1264_s28 + $0xa0] sm:$0xff] %v521_v24  ;;  %v522_v15 = vadd.f32 %v506_v39, %v437_v44  ;;  %v438_v57 = vadd.f32 %v422_v46, %v353_v37  ;;  %v509_v25 = vmul.f32 %v1735_v31, %v1489_v30  ;;  %v271_v26 = vmul.f32 %v1475_v62, %v1736_v7  ;;  %v1748_v46 = vld [vmem:[#allocation31_spill] sm:$0xff]  ;;  %v1749_v24 = vld [vmem:[#allocation32_spill] sm:$0xff]  ;;  %v1750_v37 = vld [vmem:[#allocation33_spill] sm:$0xff] }
  0x75   : > { %v439_v1 = vadd.f32 %v423_v58, %v354_v29  ;;  %v355_v61 = vadd.f32 %v339_v0, %v270_v10  ;;  %v340_v35 = vmul.f32 %v1314_v55, %v1478_v6  ;;  %v425_v8 = vmul.f32 %v1737_v4, %v1486_v17  ;;  %v1741_v55 = vld [vmem:[#allocation24_spill] sm:$0xff]  ;;  %v1751_v10 = vld [vmem:[#allocation34_spill] sm:$0xff]  ;;  %v1752_v0 = vld [vmem:[#allocation35_spill] sm:$0xff] }
  0x76   : > { %782 = vst [vmem:[%s1264_s28 + $0xa8] sm:$0xff] %v522_v15  ;;  %v523_v12 = vadd.f32 %v507_v51, %v438_v57  ;;  %v510_v47 = vmul.f32 %v1738_v14, %v1489_v30  ;;  %v272_v2 = vmul.f32 %v1475_v62, %v1739_v32  ;;  %v341_v20 = vmul.f32 %v1740_v23, %v1478_v6  ;;  %v1753_v31 = vld [vmem:[#allocation36_spill] sm:$0xff] }
  0x77   : > { %v524_v56 = vadd.f32 %v508_v59, %v439_v1  ;;  %v440_v5 = vadd.f32 %v424_v38, %v355_v61  ;;  %v356_v9 = vadd.f32 %v340_v35, %v271_v26  ;;  %v426_v21 = vmul.f32 %v1741_v55, %v1486_v17  ;;  %v1754_v35 = vld [vmem:[#allocation37_spill] sm:$0xff] }
  0x78   : > { %783 = vst [vmem:[%s1264_s28 + $0xb0] sm:$0xff] %v523_v12  ;;  %v511_v22 = vmul.f32 %v1742_v18, %v1489_v30  ;;  %v273_v28 = vmul.f32 %v1475_v62, %v1743_v27  ;;  %v342_v42 = vmul.f32 %v1744_v19, %v1478_v6  ;;  %v357_v34 = vadd.f32 %v341_v20, %v272_v2 }
  0x79   : > { %784 = vst [vmem:[%s1264_s28 + $0xb8] sm:$0xff] %v524_v56  ;;  %v525_v16 = vadd.f32 %v509_v25, %v440_v5  ;;  %v441_v33 = vadd.f32 %v425_v8, %v356_v9  ;;  %v427_v39 = vmul.f32 %v1745_v11, %v1486_v17  ;;  %v512_v45 = vmul.f32 %v1746_v43, %v1489_v30  ;;  %v1756_v8 = vld [vmem:[#allocation39_spill] sm:$0xff] }
  0x7a   : > { %v358_v40 = vadd.f32 %v342_v42, %v273_v28  ;;  %v274_v41 = vmul.f32 %v1475_v62, %v1747_v49  ;;  %v343_v51 = vmul.f32 %v1748_v46, %v1478_v6  ;;  %v442_v53 = vadd.f32 %v426_v21, %v357_v34 }
  0x7b   : > { %785 = vst [vmem:[%s1264_s28 + $0xc0] sm:$0xff] %v525_v16  ;;  %v526_v52 = vadd.f32 %v510_v47, %v441_v33  ;;  %v428_v44 = vmul.f32 %v1749_v24, %v1486_v17  ;;  %v513_v58 = vmul.f32 %v1750_v37, %v1489_v30  ;;  %v275_v13 = vmul.f32 %v1475_v62, %v1751_v10 }
  0x7c   : > { %v443_v29 = vadd.f32 %v427_v39, %v358_v40  ;;  %v359_v59 = vadd.f32 %v343_v51, %v274_v41  ;;  %v344_v15 = vmul.f32 %v1752_v0, %v1478_v6  ;;  %v527_v57 = vadd.f32 %v511_v22, %v442_v53 }
  0x7d   : > { %786 = vst [vmem:[%s1264_s28 + $0xc8] sm:$0xff] %v526_v52  ;;  %v429_v3 = vmul.f32 %v1409_v50, %v1486_v17  ;;  %v514_v38 = vmul.f32 %v1412_v60, %v1489_v30  ;;  %v276_v25 = vmul.f32 %v1475_v62, %v1753_v31  ;;  %v345_v26 = vmul.f32 %v1425_v63, %v1478_v6  ;;  %v1755_v50 = vld [vmem:[#allocation38_spill] sm:$0xff] }
  0x7e   : > { %v528_v1 = vadd.f32 %v512_v45, %v443_v29  ;;  %v444_v61 = vadd.f32 %v428_v44, %v359_v59  ;;  %v360_v7 = vadd.f32 %v344_v15, %v275_v13  ;;  %787 = vst [vmem:[%s1264_s28 + $0xd0] sm:$0xff] %v527_v57  ;;  %v430_v12 = vmul.f32 %v1754_v35, %v1486_v17 }
  0x7f   : > { %v515_v4 = vmul.f32 %v1755_v50, %v1489_v30  ;;  %v277_v60 = vmul.f32 %v1475_v62, %v1440_v48  ;;  %v346_v14 = vmul.f32 %v1756_v8, %v1478_v6  ;;  %v361_v32 = vadd.f32 %v345_v26, %v276_v25 }
  0x80   : > { %788 = vst [vmem:[%s1264_s28 + $0xd8] sm:$0xff] %v528_v1  ;;  %v529_v47 = vadd.f32 %v513_v58, %v444_v61  ;;  %v445_v63 = vadd.f32 %v429_v3, %v360_v7  ;;  %v431_v2 = vmul.f32 %v1453_v36, %v1486_v17  ;;  %v516_v5 = vmul.f32 %v1458_v54, %v1489_v30 }
  0x81   : > { %v362_v56 = vadd.f32 %v346_v14, %v277_v60  ;;  %v446_v62 = vadd.f32 %v430_v12, %v361_v32 }
  0x82   : > { %789 = vst [vmem:[%s1264_s28 + $0xe0] sm:$0xff] %v529_v47  ;;  %v530_v9 = vadd.f32 %v514_v38, %v445_v63 }
  0x83   : > { %v447_v48 = vadd.f32 %v431_v2, %v362_v56  ;;  %v531_v23 = vadd.f32 %v515_v4, %v446_v62 }
  0x84   : > { %790 = vst [vmem:[%s1264_s28 + $0xe8] sm:$0xff] %v530_v9 }
  0x85   : > { %v532_v6 = vadd.f32 %v516_v5, %v447_v48  ;;  %791 = vst [vmem:[%s1264_s28 + $0xf0] sm:$0xff] %v531_v23 }
  0x87   : > { %792 = vst [vmem:[%s1264_s28 + $0xf8] sm:$0xff] %v532_v6 }
  0x88   : > { %s802_s7 = sshll.u32 %s962_s12, 7  ;;  %s592_s8 = sshll.u32 %s1264_s28, 4  ;;  %s593_s8 = int_to_ptr.vmem [resolvable:$true] %s592_s8 }
  0x89   : > { %s581_s27 = scalar_lea.hbm %s1678_s2, %s802_s7  ;;  %s979_s26 = smov 2048  }
  0x8a   : > { %s594_s19 = sshll.u32 %s581_s27, 4  ;;  %816 = sst [smem:[#allocation11]] (%p1058_p9), %s979_s26  ;;  %s595_s19 = int_to_ptr.hbm [resolvable:$true] %s594_s19 }
  0x8b   : > { %s980_s18 = smov 8192   ;;  %s981_s20 = smov 8  }
  0x8c   : > { %817 = sst [smem:[#allocation11 + $0x1]] (%p1058_p9), %s980_s18  ;;  %s982_s12 = smov 256  }
  0x8d   : > { %818 = sst [smem:[#allocation11 + $0x2]] (%p1058_p9), %s981_s20  ;;  %s983_s16 = smov 16  }
  0x8e   : > { %819 = sst [smem:[#allocation11 + $0x3]] (%p1058_p9), %s982_s12  ;;  %s984_s21 = smov [#allocation10]  }
  0x8f   : > { %820 = sst [smem:[#allocation11 + $0x4]] (%p1058_p9), %s982_s12  ;;  %s985_s22 = smov 0  }
  0x90   : > { %821 = sst [smem:[#allocation11 + $0x5]] (%p1058_p9), %s983_s16 }
  0x91   : > { %822 = dma.general (%p1058_p9), %s593_s8, 4096, %s595_s19, %s567_s5, %s984_s21, [#allocation11], %s985_s22, 0  }
  0x92 PF: > { %p834_p4 = scmp.ge.s32.totalorder %s970_s14, 2  ;;  %s622_s28 = sand.u32 1, %s950_s9  }
  0x93   : > { %s623_s29 = scalar_lea.sflag [#allocation4], %s622_s28 }
  0x94   : > { %p829_p5 = pnand %p834_p4, %p1065_p11 }
  0x96   : > { %p830_p6 = pneg %p829_p5 }
  0x98   : > { %945 = dma.done.wait (%p830_p6), %s623_s29, 4096  }
  0x99   : > { %947 = vsyncadd (%p830_p6), %s623_s29, 4294963200  ;;  %s19_s14 = sadd.s32 1, %s970_s14   ;;  %s1757_s9 = smov %s954_s10 }
  0x9a   : > { %p16_p7 = scmp.ge.s32.totalorder %s19_s14, 6   ;;  %s1758_s10 = smov %s958_s11 }
  0x9b   : > { %s1759_s11 = smov %s1063_s24  ;;  %s1760_s12 = smov %s966_s13 }
  0x9c   : > { %s1761_s13 = smov %s1763_s17  ;;  %18 = sbr.rel (!%p16_p7) target bundleno = 7 (0x7), region = 92 }
  0xa1   :  { %629 = vsyncpa [#allocation3], 1 }
  0xa2   :  { %631 = vsyncpa [#allocation3 + $0x1], 1 }
  0xa3   :  { %632 = vsyncpa [#allocation4], 1 }
  0xa4   :  { %634 = vsyncpa [#allocation4 + $0x1], 1 }
  0xa5   :  { %635 = vsyncpa [#allocation5], 1 }
  0xa6   :  { %637 = vsyncpa [#allocation5 + $0x1], 1 }

</bundles_post_ra>
